<compile_context>
chip_gen: v6e
topology: v6e:2x2x1
jax: 0.10.0
libtpu: 0.0.40
codegen_flags: <defaults>
</compile_context>

<pallas_src>
import functools

import jax
import jax.numpy as jnp
from jax import lax
from jax.experimental import pallas as pl
from jax.experimental.pallas import tpu as pltpu


def _round_up(x, m):
    return ((x + m - 1) // m) * m


def _cross_encoder_kernel(x1_ref, x2_ref, w_ref, b_ref, out_ref, acc_ref, *,
                          inv_seq):
    # x1_ref, x2_ref : (TB, TS, H)  token features for the two texts (streamed)
    # w_ref          : (H, E)       bf16 projection weight (VMEM-resident)
    # b_ref          : (1, E)       f32 projection bias (VMEM-resident)
    # out_ref        : (TB, 128)    cosine score broadcast across lanes
    # acc_ref        : (2*TB, H)    f32 running sequence-sum (u rows, then v)
    s = pl.program_id(1)
    tb = x1_ref.shape[0]

    @pl.when(s == 0)
    def _():
        acc_ref[...] = jnp.zeros_like(acc_ref)

    # Accumulate the sequence sum in f32; the mean's 1/S is applied after the
    # projection on the much smaller (2*TB, E) tensor.
    acc_ref[0:tb, :] += jnp.sum(x1_ref[...].astype(jnp.float32), axis=1)
    acc_ref[tb:2 * tb, :] += jnp.sum(x2_ref[...].astype(jnp.float32), axis=1)

    @pl.when(s == pl.num_programs(1) - 1)
    def _():
        # Both branches fused into one (2*TB, H) @ (H, E) bf16 MXU matmul with
        # f32 accumulation (doubles M-row fill, halves weight pushes).
        pooled = acc_ref[...].astype(jnp.bfloat16)
        proj = jnp.dot(pooled, w_ref[...], preferred_element_type=jnp.float32)
        emb = proj * jnp.float32(inv_seq) + b_ref[...]            # (2*TB, E)
        u = emb[0:tb, :]
        v = emb[tb:2 * tb, :]

        # torch.cosine_similarity(u, v, dim=1, eps=1e-8):
        #   dot / max(||u||*||v||, eps) == dot * rsqrt(max(||u||^2*||v||^2, eps^2))
        dot = jnp.sum(u * v, axis=-1, keepdims=True)              # (TB, 1)
        uu = jnp.sum(u * u, axis=-1, keepdims=True)
        vv = jnp.sum(v * v, axis=-1, keepdims=True)
        cos = dot * lax.rsqrt(jnp.maximum(uu * vv, jnp.float32(1e-16)))

        # Lane-dense store: unmasked vst of a 128-wide slab.
        out_ref[...] = jnp.broadcast_to(cos, (tb, 128)).astype(out_ref.dtype)


def _estimate_vmem_bytes(tb, ts, H, E, in_itemsize):
    """Full VMEM accounting for one pipelined grid step."""
    stream = 2 * 2 * tb * ts * H * in_itemsize          # x1/x2, double-buffered
    upcast = 0 if in_itemsize >= 4 else 2 * tb * ts * H * 4  # f32 working copies
    w_buf = 2 * H * E * 2                               # bf16 weight, 2 buffers
    b_buf = 2 * 8 * max(E, 128) * 4                     # padded bias tiles
    out_buf = 2 * tb * 128 * 4                          # output, double-buffered
    acc = 2 * tb * H * 4                                # pooled-sum scratch
    epilogue = 2 * tb * H * 2 + 2 * (2 * tb * E * 4)    # bf16 pooled + proj/emb
    return stream + upcast + w_buf + b_buf + out_buf + acc + epilogue


def cross_encoder_forward(x1, x2, w, b, *, tb=None, ts=None):
    """Pallas forward: cosine_similarity(embed(x1), embed(x2)) -> (B,)."""
    B, S, H = x1.shape
    Hw, E = w.shape
    assert Hw == H and x2.shape == (B, S, H)
    assert b.reshape(-1).shape[0] == E

    # Pre-cast the weight to bf16 once (tiny one-time XLA op); bias stays f32.
    w_bf16 = w.astype(jnp.bfloat16)
    b_f32 = b.reshape(1, E).astype(jnp.float32)
    # NOTE: x1/x2 are streamed in the caller's dtype; provide bf16 features to
    # halve HBM traffic on this memory-bound kernel (no wrapper-side cast,
    # which would itself cost a full HBM read+write pass).
    in_itemsize = jnp.dtype(x1.dtype).itemsize

    # --- generation-aware VMEM budget --------------------------------------
    try:
        vmem_cap = int(pltpu.get_tpu_info().vmem_capacity_bytes)
    except Exception:  # interpret mode / older runtimes
        vmem_cap = 64 * 1024 * 1024
    # ~96 MiB limit on v5e/v6e (128 MiB physical), ~48 MiB on v7x (64 MiB).
    vmem_limit = min(vmem_cap * 3 // 4, 100 * 1024 * 1024)
    budget = vmem_limit - 4 * 1024 * 1024   # headroom for compiler scratch/spills

    # --- tile selection -----------------------------------------------------
    # Sequence tile must divide S and be a multiple of 8 (or equal S).
    ts_cands = sorted({d for d in range(8, S, 8) if S % d == 0} | {S})
    ts_min = ts_cands[0] if ts is None else ts
    assert ts_min in ts_cands, f"ts must divide S and be 8-aligned (or == S)"

    if tb is None:
        tb_cap = min(512, _round_up(B, 8))
        if B >= 16:
            # Keep >= 2 batch tiles so the "parallel" axis can shard across the
            # 2 TensorCores on v7x (harmless on 1-TC v5e/v6e).
            tb_cap = min(tb_cap, _round_up(-(-B // 2), 8))
        tb = tb_cap
        while tb > 8 and _estimate_vmem_bytes(tb, ts_min, H, E, in_itemsize) > budget:
            tb -= 8
    tb = max(8, (int(tb) // 8) * 8)          # sublane-aligned batch tile

    if ts is None:
        ts = ts_min
        for cand in ts_cands:                # grow the sequence tile while it fits
            if _estimate_vmem_bytes(tb, cand, H, E, in_itemsize) <= budget:
                ts = cand

    est = _estimate_vmem_bytes(tb, ts, H, E, in_itemsize)
    if est > vmem_limit:
        raise ValueError(
            f"CrossEncoder kernel VMEM estimate {est} B exceeds limit {vmem_limit} B")

    # No wrapper-side pad: Pallas masks the partial last batch block; OOB rows
    # produce garbage cosines that are sliced away below (never reduced over).
    n_b = -(-B // tb)
    n_s = S // ts

    kernel = functools.partial(_cross_encoder_kernel, inv_seq=1.0 / S)

    grid_spec = pltpu.PrefetchScalarGridSpec(
        num_scalar_prefetch=0,
        grid=(n_b, n_s),
        in_specs=[
            pl.BlockSpec((tb, ts, H), lambda i, s: (i, s, 0)),
            pl.BlockSpec((tb, ts, H), lambda i, s: (i, s, 0)),
            # Constant index_maps -> weight/bias stay VMEM-resident.
            pl.BlockSpec((H, E), lambda i, s: (0, 0)),
            pl.BlockSpec((1, E), lambda i, s: (0, 0)),
        ],
        out_specs=pl.BlockSpec((tb, 128), lambda i, s: (i, 0)),
        scratch_shapes=[pltpu.VMEM((2 * tb, H), jnp.float32)],
    )

    out = pl.pallas_call(
        kernel,
        out_shape=jax.ShapeDtypeStruct((B, 128), jnp.float32),
        grid_spec=grid_spec,
        compiler_params=pltpu.CompilerParams(
            dimension_semantics=("parallel", "arbitrary"),
            vmem_limit_bytes=int(vmem_limit),
        ),
    )(x1, x2, w_bf16, b_f32)

    return out[:B, 0]


def _reference_forward(x1, x2, w, b):
    # Pure-JAX f32 reference matching the torch semantics.
    u = jnp.mean(x1.astype(jnp.float32), axis=1) @ w + b
    v = jnp.mean(x2.astype(jnp.float32), axis=1) @ w + b
    dot = jnp.sum(u * v, axis=-1)
    denom = jnp.maximum(
        jnp.linalg.norm(u, axis=-1) * jnp.linalg.norm(v, axis=-1), 1e-8)
    return dot / denom


if __name__ == "__main__":
    # Small shapes: batch=8, seq=8, hidden=32, embedding dim=32.
    B, S, H, E = 8, 8, 32, 32
    key = jax.random.PRNGKey(0)
    k1, k2, kw, kb = jax.random.split(key, 4)

    # Two "features" (the two texts of each pair), as dense token features.
    x1 = jax.random.normal(k1, (B, S, H), dtype=jnp.float32)
    x2 = jax.random.normal(k2, (B, S, H), dtype=jnp.float32)

    # Deterministic synthetic semantics-model parameters.
    w = jax.random.normal(kw, (H, E), dtype=jnp.float32) * 0.05
    b = jax.random.normal(kb, (E,), dtype=jnp.float32) * 0.01

    out = cross_encoder_forward(x1, x2, w, b)
    out = jax.block_until_ready(out)

    ref = _reference_forward(x1, x2, w, b)
    assert out.shape == (B,)
    # Loose tolerance: the kernel feeds the MXU bf16 (full-rate path) with f32
    # accumulation; cosine scores agree with the f32 reference to ~1e-2.
    assert jnp.allclose(out, ref, atol=2e-2, rtol=2e-2), (out, ref)

    print("KERNEL_OK")
</pallas_src>

<mosaic_0001>
module attributes {stable_mosaic.version = 11 : i64} {
  func.func @_cross_encoder_kernel(%arg0: i32, %arg1: i32, %arg2: memref<8x8x32xf32, #tpu.memory_space<vmem>>, %arg3: memref<8x8x32xf32, #tpu.memory_space<vmem>>, %arg4: memref<32x32xbf16, #tpu.memory_space<vmem>>, %arg5: memref<1x32xf32, #tpu.memory_space<vmem>>, %arg6: memref<8x128xf32, #tpu.memory_space<vmem>>, %arg7: memref<16x32xf32, #tpu.memory_space<vmem>>) attributes {dimension_semantics = [#tpu.dimension_semantics<parallel>, #tpu.dimension_semantics<arbitrary>], iteration_bounds = array<i64: 1, 1>, scalar_prefetch = 0 : i64, scratch_operands = 1 : i64, tpu.core_type = #tpu.core_type<tc>, window_params = [{transform_indices = @transform_0, window_bounds = array<i64: 8, 8, 32>}, {transform_indices = @transform_1, window_bounds = array<i64: 8, 8, 32>}, {pipeline_mode = #tpu.pipeline_mode<synchronous>, transform_indices = @transform_2, window_bounds = array<i64: 32, 32>}, {pipeline_mode = #tpu.pipeline_mode<synchronous>, transform_indices = @transform_3, window_bounds = array<i64: 1, 32>}, {transform_indices = @transform_4, window_bounds = array<i64: 8, 128>}]} {
    %c0_i32 = arith.constant 0 : i32
    %0 = arith.cmpi eq, %arg1, %c0_i32 : i32
    %1 = arith.extui %0 : i1 to i32
    %c0_i32_0 = arith.constant 0 : i32
    %2 = arith.cmpi ne, %1, %c0_i32_0 : i32
    scf.if %2 {
      %cst_16 = arith.constant 0.000000e+00 : f32
      %16 = vector.broadcast %cst_16 : f32 to vector<16x32xf32>
      %c0_17 = arith.constant 0 : index
      %c0_18 = arith.constant 0 : index
      %17 = vector.load %arg7[%c0_17, %c0_18] : memref<16x32xf32, #tpu.memory_space<vmem>>, vector<16x32xf32>
      tpu.vector_store %arg7[%c0_17, %c0_18], %16 {strides = array<i32>} : memref<16x32xf32, #tpu.memory_space<vmem>>, vector<16x32xf32>,
    } else {
    }
    %c0 = arith.constant 0 : index
    %c0_1 = arith.constant 0 : index
    %3 = vector.load %arg7[%c0, %c0_1] : memref<16x32xf32, #tpu.memory_space<vmem>>, vector<8x32xf32>
    %c0_2 = arith.constant 0 : index
    %c0_3 = arith.constant 0 : index
    %c0_4 = arith.constant 0 : index
    %4 = vector.load %arg2[%c0_2, %c0_3, %c0_4] : memref<8x8x32xf32, #tpu.memory_space<vmem>>, vector<8x8x32xf32>
    %cst = arith.constant dense<0.000000e+00> : vector<8x32xf32>
    %5 = vector.multi_reduction <add>, %4, %cst [1] : vector<8x8x32xf32> to vector<8x32xf32>
    %6 = arith.addf %3, %5 : vector<8x32xf32>
    %c0_5 = arith.constant 0 : index
    %c0_6 = arith.constant 0 : index
    %7 = vector.load %arg7[%c0_5, %c0_6] : memref<16x32xf32, #tpu.memory_space<vmem>>, vector<8x32xf32>
    tpu.vector_store %arg7[%c0_5, %c0_6], %6 {strides = array<i32>} : memref<16x32xf32, #tpu.memory_space<vmem>>, vector<8x32xf32>,
    %c8 = arith.constant 8 : index
    %c0_7 = arith.constant 0 : index
    %8 = vector.load %arg7[%c8, %c0_7] : memref<16x32xf32, #tpu.memory_space<vmem>>, vector<8x32xf32>
    %c0_8 = arith.constant 0 : index
    %c0_9 = arith.constant 0 : index
    %c0_10 = arith.constant 0 : index
    %9 = vector.load %arg3[%c0_8, %c0_9, %c0_10] : memref<8x8x32xf32, #tpu.memory_space<vmem>>, vector<8x8x32xf32>
    %cst_11 = arith.constant dense<0.000000e+00> : vector<8x32xf32>
    %10 = vector.multi_reduction <add>, %9, %cst_11 [1] : vector<8x8x32xf32> to vector<8x32xf32>
    %11 = arith.addf %8, %10 : vector<8x32xf32>
    %c8_12 = arith.constant 8 : index
    %c0_13 = arith.constant 0 : index
    %12 = vector.load %arg7[%c8_12, %c0_13] : memref<16x32xf32, #tpu.memory_space<vmem>>, vector<8x32xf32>
    tpu.vector_store %arg7[%c8_12, %c0_13], %11 {strides = array<i32>} : memref<16x32xf32, #tpu.memory_space<vmem>>, vector<8x32xf32>,
    %c0_i32_14 = arith.constant 0 : i32
    %13 = arith.cmpi eq, %arg1, %c0_i32_14 : i32
    %14 = arith.extui %13 : i1 to i32
    %c0_i32_15 = arith.constant 0 : i32
    %15 = arith.cmpi ne, %14, %c0_i32_15 : i32
    scf.if %15 {
      %c0_16 = arith.constant 0 : index
      %c0_17 = arith.constant 0 : index
      %16 = vector.load %arg7[%c0_16, %c0_17] : memref<16x32xf32, #tpu.memory_space<vmem>>, vector<16x32xf32>
      %17 = arith.truncf %16 : vector<16x32xf32> to vector<16x32xbf16>
      %c0_18 = arith.constant 0 : index
      %c0_19 = arith.constant 0 : index
      %18 = vector.load %arg4[%c0_18, %c0_19] : memref<32x32xbf16, #tpu.memory_space<vmem>>, vector<32x32xbf16>
      %cst_20 = arith.constant dense<0.000000e+00> : vector<16x32xf32>
      %19 = tpu.matmul %17, %18, %cst_20 {dimension_numbers = #tpu.dot_dimension_numbers<[1], [0], [0], [1], [0, 0, 1, 1], [], []>} : vector<16x32xbf16>, vector<32x32xbf16>, vector<16x32xf32> -> vector<16x32xf32>
      %cst_21 = arith.constant 1.250000e-01 : f32
      %20 = vector.broadcast %cst_21 : f32 to vector<16x32xf32>
      %21 = arith.mulf %19, %20 : vector<16x32xf32>
      %c0_22 = arith.constant 0 : index
      %c0_23 = arith.constant 0 : index
      %22 = vector.load %arg5[%c0_22, %c0_23] : memref<1x32xf32, #tpu.memory_space<vmem>>, vector<1x32xf32>
      %23 = vector.broadcast %22 : vector<1x32xf32> to vector<16x32xf32>
      %24 = arith.addf %21, %23 : vector<16x32xf32>
      %25 = vector.extract_strided_slice %24 {offsets = [0, 0], sizes = [8, 32], strides = [1, 1]} : vector<16x32xf32> to vector<8x32xf32>
      %26 = vector.extract_strided_slice %24 {offsets = [8, 0], sizes = [8, 32], strides = [1, 1]} : vector<16x32xf32> to vector<8x32xf32>
      %27 = arith.mulf %25, %26 : vector<8x32xf32>
      %cst_24 = arith.constant dense<0.000000e+00> : vector<8xf32>
      %28 = vector.multi_reduction <add>, %27, %cst_24 [1] : vector<8x32xf32> to vector<8xf32>
      %29 = vector.shape_cast %28 : vector<8xf32> to vector<8x1xf32>
      %30 = arith.mulf %25, %25 : vector<8x32xf32>
      %cst_25 = arith.constant dense<0.000000e+00> : vector<8xf32>
      %31 = vector.multi_reduction <add>, %30, %cst_25 [1] : vector<8x32xf32> to vector<8xf32>
      %32 = vector.shape_cast %31 : vector<8xf32> to vector<8x1xf32>
      %33 = arith.mulf %26, %26 : vector<8x32xf32>
      %cst_26 = arith.constant dense<0.000000e+00> : vector<8xf32>
      %34 = vector.multi_reduction <add>, %33, %cst_26 [1] : vector<8x32xf32> to vector<8xf32>
      %35 = vector.shape_cast %34 : vector<8xf32> to vector<8x1xf32>
      %36 = arith.mulf %32, %35 : vector<8x1xf32>
      %cst_27 = arith.constant 1.000000e-16 : f32
      %37 = vector.broadcast %cst_27 : f32 to vector<8x1xf32>
      %38 = arith.maximumf %36, %37 : vector<8x1xf32>
      %39 = math.rsqrt %38 : vector<8x1xf32>
      %40 = arith.mulf %29, %39 : vector<8x1xf32>
      %41 = vector.shape_cast %40 : vector<8x1xf32> to vector<8x1xf32>
      %42 = vector.broadcast %41 : vector<8x1xf32> to vector<8x128xf32>
      %c0_28 = arith.constant 0 : index
      %c0_29 = arith.constant 0 : index
      %43 = vector.load %arg6[%c0_28, %c0_29] : memref<8x128xf32, #tpu.memory_space<vmem>>, vector<8x128xf32>
      tpu.vector_store %arg6[%c0_28, %c0_29], %42 {strides = array<i32>} : memref<8x128xf32, #tpu.memory_space<vmem>>, vector<8x128xf32>,
    } else {
    }
    return
  }
  func.func @transform_0(%arg0: i32, %arg1: i32) -> (i32, i32, i32) {
    %c0_i32 = arith.constant 0 : i32
    %c0_i32_0 = arith.constant 0 : i32
    return %arg0, %arg1, %c0_i32 : i32, i32, i32
  }
  func.func @transform_1(%arg0: i32, %arg1: i32) -> (i32, i32, i32) {
    %c0_i32 = arith.constant 0 : i32
    %c0_i32_0 = arith.constant 0 : i32
    return %arg0, %arg1, %c0_i32 : i32, i32, i32
  }
  func.func @transform_2(%arg0: i32, %arg1: i32) -> (i32, i32) {
    %c0_i32 = arith.constant 0 : i32
    %c0_i32_0 = arith.constant 0 : i32
    %c0_i32_1 = arith.constant 0 : i32
    return %c0_i32, %c0_i32_0 : i32, i32
  }
  func.func @transform_3(%arg0: i32, %arg1: i32) -> (i32, i32) {
    %c0_i32 = arith.constant 0 : i32
    %c0_i32_0 = arith.constant 0 : i32
    %c0_i32_1 = arith.constant 0 : i32
    return %c0_i32, %c0_i32_0 : i32, i32
  }
  func.func @transform_4(%arg0: i32, %arg1: i32) -> (i32, i32) {
    %c0_i32 = arith.constant 0 : i32
    %c0_i32_0 = arith.constant 0 : i32
    return %arg0, %c0_i32 : i32, i32
  }
}

</mosaic_0001>

<bundles_post_ra>
// kernel: tpu_custom_call.1
= control target key start
LH: loop header
LB: loop body
LE: loop exit
PB: predicated region body
PF: predicated region fallthrough
CT: control target
= control target key end

     0   :  { %9 = vsyncpa [#allocation4], 0  ;;  %s554_s0 = inlined_call_operand.hbm [shape: f32[8,8,32], index: 0, kind: input, shape index: {}]   ;;  %s555_s1 = inlined_call_operand.hbm [shape: f32[8,8,32], index: 1, kind: input, shape index: {}]   ;;  %s556_s2 = inlined_call_operand.hbm [shape: bf16[32,32], index: 2, kind: input, shape index: {}]   ;;  %s557_s3 = inlined_call_operand.vmem [shape: f32[1,32], index: 3, kind: input, shape index: {}]   ;;  %s558_s4 = inlined_call_operand.hbm [shape: f32[8,128], index: 4, kind: output, shape index: {}]  }
   0x1   :  { %10 = vsyncpa [#allocation7], 0 }
   0x2   :  { %11 = vsyncpa [#allocation5], 0  ;;  %s466_s15 = smov [#allocation6]   ;;  %s467_s17 = smov [#allocation3]  }
   0x3   :  { %s29_s16 = sshll.u32 %s466_s15, 4  ;;  %s17_s18 = sshll.u32 %s467_s17, 4  ;;  %s30_s16 = int_to_ptr.vmem [resolvable:$true] %s29_s16  ;;  %s18_s18 = int_to_ptr.vmem [resolvable:$true] %s17_s18 }
   0x4   :  { %s388_s19 = scalar_lea.vmem %s30_s16, 1024  ;;  %p393_p1 = scmp.lt.s32.totalorder %s30_s16, %s30_s16 }
   0x5   :  { %p389_p0 = scmp.ne.s32.totalorder %s30_s16, %s388_s19  ;;  %p394_p2 = scmp.lt.s32.totalorder %s388_s19, %s388_s19 }
   0x7   :  { %p395_p3 = por %p394_p2, %p393_p1 }
   0x9   :  { %p396_p4 = pnand %p395_p3, %p389_p0 }
   0xb   :  { %399 = shalt.err (!%p396_p4)
}
   0xc   :  { %s468_s20 = smov 128   ;;  %s469_s21 = smov 8  }
   0xd   :  { %35 = dma.hbm_to_vmem [thread:$0]  %s555_s1, 1024, %s30_s16, [#allocation7], %s468_s20, %s468_s20, %s469_s21  }
   0xe   :  { %s408_s24 = scalar_lea.vmem %s18_s18, 1024  ;;  %p413_p6 = scmp.lt.s32.totalorder %s18_s18, %s18_s18 }
   0xf   :  { %p409_p5 = scmp.ne.s32.totalorder %s18_s18, %s408_s24  ;;  %p414_p7 = scmp.lt.s32.totalorder %s408_s24, %s408_s24 }
  0x11   :  { %p415_p8 = por %p414_p7, %p413_p6 }
  0x13   :  { %p416_p9 = pnand %p415_p8, %p409_p5 }
  0x15   :  { %419 = shalt.err (!%p416_p9)
}
  0x16   :  { %23 = dma.hbm_to_vmem [thread:$0]  %s554_s0, 1024, %s18_s18, [#allocation4], %s468_s20, %s468_s20, %s469_s21  }
  0x17   :  { %s470_s27 = smov [#allocation8]  }
  0x18   :  { %s41_s28 = sshll.u32 %s470_s27, 4  ;;  %s42_s28 = int_to_ptr.vmem [resolvable:$true] %s41_s28 }
  0x19   :  { %s428_s29 = scalar_lea.vmem %s42_s28, 256  ;;  %p433_p11 = scmp.lt.s32.totalorder %s42_s28, %s42_s28 }
  0x1a   :  { %p429_p10 = scmp.ne.s32.totalorder %s42_s28, %s428_s29  ;;  %p434_p12 = scmp.lt.s32.totalorder %s428_s29, %s428_s29 }
  0x1c   :  { %p435_p13 = por %p434_p12, %p433_p11 }
  0x1e   :  { %p436_p0 = pnand %p435_p13, %p429_p10 }
  0x20   :  { %439 = shalt.err (!%p436_p0)
}
  0x21   :  { %s471_s1 = smov 64   ;;  %s472_s30 = smov 4  }
  0x22   :  { %47 = dma.hbm_to_vmem [thread:$0]  %s556_s2, 256, %s42_s28, [#allocation7], %s471_s1, %s471_s1, %s472_s30  }
  0x23   :  { %460 = dma.done.wait [#allocation4], 1024  }
  0x24   :  { %461 = vsyncadd [#allocation4], 4294966272 }
  0x25   :  { %462 = dma.done.wait [#allocation7], 1280  }
  0x26   :  { %463 = vsyncadd [#allocation7], 4294966016  ;;  %vm64_vm0 = vcmask 261120   ;;  %v473_v0 = vmov 0.0   ;;  %vm474_vm1 = vmmov 0   ;;  %v68_v1 = vld [vmem:[#allocation3] sm:$0xff] }
  0x27   :  { %65 = vst.msk [vmem:[#allocation2] sm:$0xff] %vm64_vm0, %v473_v0  ;;  %66 = vst.msk [vmem:[#allocation2 + $0x8] sm:$0xff] %vm64_vm0, %v473_v0  ;;  %358 = vmatprep.subr.bf16.mxu0 %v473_v0  ;;  %362 = vmatprep.mubr.msk.bf16.mxu0 %vm474_vm1, %v473_v0  ;;  %v69_v2 = vld [vmem:[#allocation3 + $0x8] sm:$0xff]  ;;  %v70_v3 = vld [vmem:[#allocation3 + $0x10] sm:$0xff]  ;;  %v77_v6 = vsel %vm64_vm0, %v68_v1, 0.0  ;;  %vm141_vm2 = vcmask 1041409  }
  0x28   :  { %v71_v4 = vld [vmem:[#allocation3 + $0x18] sm:$0xff]  ;;  %v72_v5 = vld [vmem:[#allocation3 + $0x20] sm:$0xff]  ;;  %v84_v7 = vsel %vm64_vm0, %v69_v2, 0.0  ;;  %v91_v8 = vsel %vm64_vm0, %v70_v3, 0.0  ;;  %v73_v9 = vld [vmem:[#allocation3 + $0x28] sm:$0xff]  ;;  %v78_v12 = vrot.slane %v77_v6, 4 }
  0x29   :  { %v74_v10 = vld [vmem:[#allocation3 + $0x30] sm:$0xff]  ;;  %v75_v11 = vld [vmem:[#allocation3 + $0x38] sm:$0xff]  ;;  %v85_v13 = vrot.slane %v84_v7, 4  ;;  %v92_v14 = vrot.slane %v91_v8, 4  ;;  %v98_v15 = vsel %vm64_vm0, %v71_v4, 0.0  ;;  %v105_v16 = vsel %vm64_vm0, %v72_v5, 0.0 }
  0x2a   :  { %v112_v17 = vsel %vm64_vm0, %v73_v9, 0.0  ;;  %v119_v18 = vsel %vm64_vm0, %v74_v10, 0.0  ;;  %v79_v19 = vadd.f32 %v78_v12, %v77_v6  ;;  %v99_v22 = vrot.slane %v98_v15, 4  ;;  %v376_v31 = vld [vmem:[#allocation8 + $0x8] sm:$0xff]   ;;  %v377_v40 = vld [vmem:[#allocation8] sm:$0xff]   ;;  %v161_v63 = vld [vmem:[#allocation6 + $0x10] sm:$0xff] }
  0x2b   :  { %v86_v20 = vadd.f32 %v85_v13, %v84_v7  ;;  %v93_v21 = vadd.f32 %v92_v14, %v91_v8  ;;  %v106_v23 = vrot.slane %v105_v16, 4  ;;  %v113_v24 = vrot.slane %v112_v17, 4  ;;  %359 = vmatpush3.bf16.msra.mxu0 %v376_v31  ;;  %v159_v53 = vld [vmem:[#allocation6] sm:$0xff]  ;;  %v160_v54 = vld [vmem:[#allocation6 + $0x8] sm:$0xff]  ;;  %v162_v2 = vld [vmem:[#allocation6 + $0x18] sm:$0xff] }
  0x2c   :  { %v120_v25 = vrot.slane %v119_v18, 4  ;;  %v126_v26 = vsel %vm64_vm0, %v75_v11, 0.0  ;;  %vm143_vm3 = vcmask 1042434   ;;  %v80_v27 = vrot.slane %v79_v19, 2  ;;  %360 = vmatprep.subr.bf16.mxu0 %v473_v0  ;;  %v163_v10 = vld [vmem:[#allocation6 + $0x20] sm:$0xff]  ;;  %v164_v11 = vld [vmem:[#allocation6 + $0x28] sm:$0xff] }
  0x2d   :  { %v87_v28 = vrot.slane %v86_v20, 2  ;;  %v94_v29 = vrot.slane %v93_v21, 2  ;;  %v100_v30 = vadd.f32 %v99_v22, %v98_v15  ;;  %vm145_vm4 = vcmask 1043459  }
  0x2e   :  { %v107_v32 = vadd.f32 %v106_v23, %v105_v16  ;;  %v114_v33 = vadd.f32 %v113_v24, %v112_v17  ;;  %v121_v34 = vadd.f32 %v120_v25, %v119_v18  ;;  %v127_v35 = vrot.slane %v126_v26, 4  ;;  %v67_v23 = vld [vmem:[#allocation2] sm:$0xff] }
  0x2f   :  { %vm147_vm5 = vcmask 1044484   ;;  %v81_v36 = vadd.f32 %v80_v27, %v79_v19  ;;  %v88_v37 = vadd.f32 %v87_v28, %v86_v20  ;;  %v95_v38 = vadd.f32 %v94_v29, %v93_v21  ;;  %361 = vmatpush3.bf16.msra.mxu0 %v377_v40  ;;  %v165_v29 = vld [vmem:[#allocation6 + $0x30] sm:$0xff] }
  0x30   :  { %v101_v39 = vrot.slane %v100_v30, 2  ;;  %vm149_vm6 = vcmask 1045509   ;;  %v108_v41 = vrot.slane %v107_v32, 2  ;;  %v115_v42 = vrot.slane %v114_v33, 2 }
  0x31   :  { %v122_v43 = vrot.slane %v121_v34, 2  ;;  %v128_v44 = vadd.f32 %v127_v35, %v126_v26  ;;  %vm151_vm7 = vcmask 1046534   ;;  %v82_v45 = vrot.slane %v81_v36, 1 }
  0x32   :  { %v89_v46 = vrot.slane %v88_v37, 1  ;;  %v96_v47 = vrot.slane %v95_v38, 1  ;;  %v102_v48 = vadd.f32 %v101_v39, %v100_v30  ;;  %vm153_vm8 = vcmask 1047559  }
  0x33   :  { %v109_v49 = vadd.f32 %v108_v41, %v107_v32  ;;  %v116_v50 = vadd.f32 %v115_v42, %v114_v33  ;;  %v123_v51 = vadd.f32 %v122_v43, %v121_v34  ;;  %v129_v52 = vrot.slane %v128_v44, 2 }
  0x34   :  { %v83_v55 = vadd.f32 %v82_v45, %v81_v36  ;;  %v90_v56 = vadd.f32 %v89_v46, %v88_v37  ;;  %v97_v57 = vadd.f32 %v96_v47, %v95_v38  ;;  %v103_v58 = vrot.slane %v102_v48, 1  ;;  %v166_v38 = vld [vmem:[#allocation6 + $0x38] sm:$0xff] }
  0x35   :  { %v110_v59 = vrot.slane %v109_v49, 1  ;;  %v117_v60 = vrot.slane %v116_v50, 1  ;;  %v124_v61 = vrot.slane %v123_v51, 1  ;;  %v130_v62 = vadd.f32 %v129_v52, %v128_v44 }
  0x36   :  { %v104_v0 = vadd.f32 %v103_v58, %v102_v48  ;;  %v142_v1 = vsel %vm141_vm2, %v90_v56, %v83_v55  ;;  %v167_v3 = vsel %vm64_vm0, %v159_v53, 0.0  ;;  %v174_v4 = vsel %vm64_vm0, %v160_v54, 0.0 }
  0x37   :  { %v111_v5 = vadd.f32 %v110_v59, %v109_v49  ;;  %v118_v6 = vadd.f32 %v117_v60, %v116_v50  ;;  %v125_v7 = vadd.f32 %v124_v61, %v123_v51  ;;  %v131_v8 = vrot.slane %v130_v62, 1 }
  0x38   :  { %v144_v9 = vsel %vm143_vm3, %v97_v57, %v142_v1  ;;  %v168_v12 = vrot.slane %v167_v3, 4  ;;  %v175_v13 = vrot.slane %v174_v4, 4  ;;  %v181_v14 = vsel %vm64_vm0, %v161_v63, 0.0 }
  0x39   :  { %v132_v15 = vadd.f32 %v131_v8, %v130_v62  ;;  %v146_v16 = vsel %vm145_vm4, %v104_v0, %v144_v9  ;;  %v182_v17 = vrot.slane %v181_v14, 4  ;;  %v188_v18 = vsel %vm64_vm0, %v162_v2, 0.0 }
  0x3a   :  { %v148_v19 = vsel %vm147_vm5, %v111_v5, %v146_v16  ;;  %v169_v20 = vadd.f32 %v168_v12, %v167_v3  ;;  %v176_v21 = vadd.f32 %v175_v13, %v174_v4  ;;  %v189_v22 = vrot.slane %v188_v18, 4 }
  0x3b   :  { %v150_v24 = vsel %vm149_vm6, %v118_v6, %v148_v19  ;;  %v183_v25 = vadd.f32 %v182_v17, %v181_v14  ;;  %v195_v26 = vsel %vm64_vm0, %v163_v10, 0.0  ;;  %v202_v27 = vsel %vm64_vm0, %v164_v11, 0.0  ;;  %v158_v17 = vld [vmem:[#allocation2 + $0x8] sm:$0xff] }
  0x3c   :  { %v152_v28 = vsel %vm151_vm7, %v125_v7, %v150_v24  ;;  %v170_v30 = vrot.slane %v169_v20, 2  ;;  %v177_v31 = vrot.slane %v176_v21, 2  ;;  %v190_v32 = vadd.f32 %v189_v22, %v188_v18 }
  0x3d   :  { %v154_v33 = vsel %vm153_vm8, %v132_v15, %v152_v28  ;;  %v184_v34 = vrot.slane %v183_v25, 2  ;;  %v196_v35 = vrot.slane %v195_v26, 4  ;;  %v203_v36 = vrot.slane %v202_v27, 4 }
  0x3e   :  { %v156_v37 = vadd.f32 %v154_v33, %v67_v23  ;;  %v171_v39 = vadd.f32 %v170_v30, %v169_v20  ;;  %v178_v40 = vadd.f32 %v177_v31, %v176_v21  ;;  %v191_v41 = vrot.slane %v190_v32, 2 }
  0x3f   :  { %v185_v42 = vadd.f32 %v184_v34, %v183_v25  ;;  %v197_v43 = vadd.f32 %v196_v35, %v195_v26  ;;  %v204_v44 = vadd.f32 %v203_v36, %v202_v27  ;;  %v209_v45 = vsel %vm64_vm0, %v165_v29, 0.0  ;;  %v354_v25 = vld [vmem:[%s557_s3] ss:$0 sm:$0xff]  ;;  %s475_s3 = smov [#allocation9]  }
  0x40   :  { %157 = vst.msk [vmem:[#allocation2] sm:$0xff] %vm64_vm0, %v156_v37  ;;  %v172_v46 = vrot.slane %v171_v39, 1  ;;  %v179_v47 = vrot.slane %v178_v40, 1  ;;  %v192_v48 = vadd.f32 %v191_v41, %v190_v32  ;;  %v210_v49 = vrot.slane %v209_v45, 4  ;;  %s341_s7 = sshll.u32 %s475_s3, 4  ;;  %s342_s7 = int_to_ptr.vmem [resolvable:$true] %s341_s7 }
  0x41   :  { %v186_v50 = vrot.slane %v185_v42, 1  ;;  %v198_v51 = vrot.slane %v197_v43, 2  ;;  %v205_v52 = vrot.slane %v204_v44, 2  ;;  %v216_v53 = vsel %vm64_vm0, %v166_v38, 0.0  ;;  %s440_s8 = scalar_lea.vmem %s342_s7, 128  ;;  %p445_p2 = scmp.lt.s32.totalorder %s342_s7, %s342_s7 }
  0x42   :  { %v173_v54 = vadd.f32 %v172_v46, %v171_v39  ;;  %v180_v55 = vadd.f32 %v179_v47, %v178_v40  ;;  %v193_v56 = vrot.slane %v192_v48, 1  ;;  %v211_v57 = vadd.f32 %v210_v49, %v209_v45  ;;  %p441_p1 = scmp.ne.s32.totalorder %s342_s7, %s440_s8  ;;  %p446_p3 = scmp.lt.s32.totalorder %s440_s8, %s440_s8 }
  0x43   :  { %v187_v58 = vadd.f32 %v186_v50, %v185_v42  ;;  %v199_v59 = vadd.f32 %v198_v51, %v197_v43  ;;  %v206_v60 = vadd.f32 %v205_v52, %v204_v44  ;;  %v217_v61 = vrot.slane %v216_v53, 4 }
  0x44   :  { %v194_v62 = vadd.f32 %v193_v56, %v192_v48  ;;  %v212_v63 = vrot.slane %v211_v57, 2  ;;  %v231_v0 = vsel %vm141_vm2, %v180_v55, %v173_v54  ;;  %p447_p4 = por %p446_p3, %p445_p2 }
  0x45   :  { %v200_v1 = vrot.slane %v199_v59, 1  ;;  %v207_v2 = vrot.slane %v206_v60, 1  ;;  %v218_v3 = vadd.f32 %v217_v61, %v216_v53  ;;  %v232_v4 = vsel %vm143_vm3, %v187_v58, %v231_v0 }
  0x46   :  { %v213_v5 = vadd.f32 %v212_v63, %v211_v57  ;;  %v233_v6 = vsel %vm145_vm4, %v194_v62, %v232_v4  ;;  %p448_p5 = pnand %p447_p4, %p441_p1 }
  0x47   :  { %v201_v7 = vadd.f32 %v200_v1, %v199_v59  ;;  %v208_v8 = vadd.f32 %v207_v2, %v206_v60  ;;  %v219_v9 = vrot.slane %v218_v3, 2  ;;  %v244_v21 = vld [vmem:[#allocation2] sm:$0xff] }
  0x48   :  { %v214_v10 = vrot.slane %v213_v5, 1 }
  0x49   :  { %v220_v11 = vadd.f32 %v219_v9, %v218_v3  ;;  %v234_v12 = vsel %vm147_vm5, %v201_v7, %v233_v6 }
  0x4a   :  { %v215_v13 = vadd.f32 %v214_v10, %v213_v5  ;;  %v235_v14 = vsel %vm149_vm6, %v208_v8, %v234_v12 }
  0x4b   :  { %v221_v15 = vrot.slane %v220_v11, 1 }
  0x4c   :  { %v236_v16 = vsel %vm151_vm7, %v215_v13, %v235_v14 }
  0x4d   :  { %v222_v18 = vadd.f32 %v221_v15, %v220_v11 }
  0x4f   :  { %v237_v19 = vsel %vm153_vm8, %v222_v18, %v236_v16 }
  0x50   :  { %v239_v20 = vadd.f32 %v237_v19, %v158_v17 }
  0x52   :  { %240 = vst.msk [vmem:[#allocation2 + $0x8] sm:$0xff] %vm64_vm0, %v239_v20 }
  0x59   :  { %v245_v22 = vld [vmem:[#allocation2 + $0x8] sm:$0xff] }
  0x5a   :  { %v246_v23 = vpack.c.bf16 %v245_v22, %v244_v21 }
  0x5c   :  { %363 = vmatmul.mubr.msk.bf16.vlgmr.msra.gmra.mxu0 %vm64_vm0, %v246_v23 }
 0x11c   :  { %v300_v24 = vpop.f32.mrf.mxu0 }
 0x11d   :  { %v307_v26 = vmul.f32 0.125, %v300_v24 }
 0x11e   :  { %v364_v27 = vpop.f32.mrf.mxu0 }
 0x11f   :  { %v316_v28 = vadd.f32 %v354_v25, %v307_v26 }
 0x120   :  { %v303_v29 = vpop.f32.mrf.mxu0 }
 0x121   :  { %v308_v30 = vmul.f32 0.125, %v303_v29  ;;  %v322_v31 = vmul.f32 %v316_v28, %v316_v28 }
 0x122   :  { %v365_v32 = vpop.f32.mrf.mxu0 }
 0x123   :  { %v317_v33 = vadd.f32 %v354_v25, %v308_v30  ;;  %v323_v34 = vsel %vm64_vm0, %v322_v31, 0.0 }
 0x124   :  { %324 = vadd.xlane.f32.xlu0 %v323_v34 }
 0x125   :  { %v326_v35 = vmul.f32 %v317_v33, %v317_v33  ;;  %v318_v36 = vmul.f32 %v317_v33, %v316_v28 }
 0x127   :  { %v327_v37 = vsel %vm64_vm0, %v326_v35, 0.0  ;;  %v319_v38 = vsel %vm64_vm0, %v318_v36, 0.0 }
 0x128   :  { %328 = vadd.xlane.f32.xlu0 %v327_v37  ;;  %320 = vadd.xlane.f32.xlu1 %v319_v38 }
 0x1ad   :  { %v325_v39 = vpop.xlane.xlu0 %324 }
 0x1b1   :  { %v329_v40 = vpop.xlane.xlu0 %328  ;;  %v321_v44 = vpop.xlane.xlu1 %320 }
 0x1b2   :  { %v330_v41 = vmul.f32 %v329_v40, %v325_v39 }
 0x1b4   :  { %v331_v42 = vmax.f32 %v330_v41, 1e-16 }
 0x1b6   :  { %378 = vrsqrt.f32 %v331_v42 }
 0x1c3   :  { %v379_v43 = vpop.eup %378 }
 0x1c4   :  { %v333_v45 = vmul.f32 %v379_v43, %v321_v44 }
 0x1c6   :  { %334 = vst [vmem:[#allocation9] sm:$0xff] %v333_v45 }
 0x1c7   :  { %451 = shalt.err (!%p448_p5)
}
 0x1c8   :  { %344 = dma.vmem_to_hbm [thread:$0]  %s342_s7, 128, %s558_s4, [#allocation5]  }
 0x1c9   :  { %464 = dma.done.wait [#allocation5], 128  }
 0x1ca   :  { %465 = vsyncadd [#allocation5], 4294967168 }
 0x1cb   :  { %348 = vsyncpa [#allocation4], 1 }
 0x1cc   :  { %349 = vsyncpa [#allocation7], 1 }
 0x1cd   :  { %350 = vsyncpa [#allocation5], 1 }

</bundles_post_ra>
